<compile_context>
chip_gen: v7x
topology: tpu7x:2x2x1
jax: 0.10.0
libtpu: 0.0.40
codegen_flags: <defaults>
</compile_context>

<pallas_src>
import functools

import jax
import jax.numpy as jnp
from jax.experimental import pallas as pl
from jax.experimental.pallas import tpu as pltpu


def _round_up(x, m):
    return (x + m - 1) // m * m


def _choose_batch_tiling(B, tb_target=1024):
    """Pick (num_tiles, TB) for the batch grid.

    - As few grid steps as possible (per-step fixed cost ~0.35us; v5e/v6e are
      single-TC so the grid is a pure serial loop).
    - Keep >= 2 "parallel" steps once the batch is large enough (B >= 512) so
      v7x can shard the batch across its two TensorCores.
    - Output lane dim (TB) must be a multiple of 128 when tiled, or equal the
      full (padded) batch when there is a single tile.
    """
    num_tiles = max(1, pl.cdiv(B, tb_target))
    if B >= 512:
        num_tiles = max(num_tiles, 2)
    if num_tiles == 1:
        tb = _round_up(B, 8)
    else:
        tb = _round_up(pl.cdiv(B, num_tiles), 128)
    return num_tiles, tb


def _critic_kernel(sa_ref, p_ref, out_ref, *, d, d_pad, hidden, n_critics):
    """One batch-tile of the stacked 3-layer MLP. All operands VMEM-resident."""
    C, H = n_critics, hidden
    CH = C * H

    # Packed-parameter slab layout (rows x CH), W2 first so slices stay aligned:
    #   [0            : CH          )  W2 block-diagonal           (CH, CH)
    #   [CH           : CH+d        )  W1 stacked along N          (d, CH)
    #   [CH+d_pad     : CH+d_pad+1  )  b1 stacked                  (1, CH)
    #   [CH+d_pad+1   : CH+d_pad+2  )  b2 stacked                  (1, CH)
    #   [CH+d_pad+2   : ...+2+C     )  W3 block rows               (C, CH)
    #   [CH+d_pad+2+C : ...+2+2C    )  b3 (each row constant b3_c) (C, CH)
    r = CH
    w2 = p_ref[0:CH, :]
    w1 = p_ref[r:r + d, :]
    r += d_pad
    b1 = p_ref[r:r + 1, :]
    b2 = p_ref[r + 1:r + 2, :]
    w3 = p_ref[r + 2:r + 2 + C, :]
    b3 = p_ref[r + 2 + C:r + 2 + 2 * C, 0:1]                 # (C, 1)

    # Layer 1: concat(obs, act) already fused into s_a; one K=d, N=C*H matmul.
    h1 = jnp.dot(sa_ref[...], w1, preferred_element_type=jnp.float32)
    h1 = jnp.maximum(h1 + b1, 0.0)

    # Layer 2: block-diagonal W2 -> one full-width matmul for all C critics.
    h2 = jnp.dot(h1, w2, preferred_element_type=jnp.float32)
    h2 = jnp.maximum(h2 + b2, 0.0)

    # Layer 3 (lane-dense): (C, CH) x (TB, CH)^T -> (C, TB), full-lane stores.
    q = jax.lax.dot_general(w3, h2, (((1,), (1,)), ((), ())),
                            preferred_element_type=jnp.float32)
    out_ref[...] = (q + b3).astype(out_ref.dtype)


def pack_params(params_list, obs_dim, act_dim, hidden):
    """Pack C critics' weights/biases into one contiguous (rows, C*H) f32 slab.

    Per-critic dict: w1 (D,H), b1 (1,H), w2 (H,H), b2 (1,H), w3 (H,1), b3 (1,1),
    all stored (in, out).  NOTE: real PyTorch nn.Linear weights are (out, in) -
    transpose them before packing when importing a checkpoint.
    """
    C = len(params_list)
    D = obs_dim + act_dim
    H = hidden
    CH = C * H
    f32 = jnp.float32

    w2_bd = jnp.zeros((CH, CH), f32)
    w3_blk = jnp.zeros((C, CH), f32)
    for c, p in enumerate(params_list):
        assert p["w1"].shape == (D, H) and p["w2"].shape == (H, H)
        w2_bd = w2_bd.at[c * H:(c + 1) * H, c * H:(c + 1) * H].set(
            p["w2"].astype(f32))
        w3_blk = w3_blk.at[c, c * H:(c + 1) * H].set(
            p["w3"].astype(f32).reshape(H))

    w1_st = jnp.concatenate([p["w1"].astype(f32) for p in params_list], axis=1)
    b1_st = jnp.concatenate([p["b1"].astype(f32) for p in params_list], axis=1)
    b2_st = jnp.concatenate([p["b2"].astype(f32) for p in params_list], axis=1)
    b3_col = jnp.concatenate(
        [p["b3"].astype(f32).reshape(1, 1) for p in params_list], axis=0)
    b3_rows = jnp.broadcast_to(b3_col, (C, CH))

    d_pad = _round_up(D, 8)
    w1_sec = jnp.pad(w1_st, ((0, d_pad - D), (0, 0)))

    packed = jnp.concatenate([w2_bd, w1_sec, b1_st, b2_st, w3_blk, b3_rows],
                             axis=0)
    rows = packed.shape[0]
    rows_pad = _round_up(rows, 8)
    if rows_pad != rows:
        packed = jnp.pad(packed, ((0, rows_pad - rows), (0, 0)))
    return packed


def critic_forward(obs_n, act_n, packed_params, *, hidden, n_critics):
    """Pallas-backed forward of `n_critics` stacked CriticNetworks.

    obs_n: (B, obs_dim) f32, act_n: (B, act_dim) f32,
    packed_params: output of pack_params().  Returns (n_critics, B) f32
    (row c = critic c's q-values; reshape to (B, 1) per critic as needed).
    """
    obs_n = obs_n.astype(jnp.float32)
    act_n = act_n.astype(jnp.float32)
    # Fuse obs/act once here -> single input DMA stream + single K=D MXU push.
    s_a = jnp.concatenate([obs_n, act_n], axis=1)
    B, D = s_a.shape
    CH = n_critics * hidden
    P_ROWS, p_cols = packed_params.shape
    assert p_cols == CH, (p_cols, CH)

    num_tiles, TB = _choose_batch_tiling(B)
    B_pad = num_tiles * TB
    if B_pad != B:
        s_a = jnp.pad(s_a, ((0, B_pad - B), (0, 0)))

    kernel = functools.partial(
        _critic_kernel, d=D, d_pad=_round_up(D, 8),
        hidden=hidden, n_critics=n_critics)

    q = pl.pallas_call(
        kernel,
        out_shape=jax.ShapeDtypeStruct((n_critics, B_pad), jnp.float32),
        grid=(num_tiles,),
        in_specs=[
            pl.BlockSpec((TB, D), lambda i: (i, 0)),
            # Constant index_map -> slab fetched once, reused across grid steps.
            pl.BlockSpec((P_ROWS, CH), lambda i: (0, 0)),
        ],
        # Lane-dense output block: batch on the lane axis, critics on sublanes.
        out_specs=pl.BlockSpec((n_critics, TB), lambda i: (0, i)),
        compiler_params=pltpu.CompilerParams(
            dimension_semantics=("parallel",)),
    )(s_a, packed_params)
    # Padded batch rows produce q = f(relu(b1)) garbage -> slice them off.
    return q[:, :B]


def init_params(key, obs_n_dim, act_n_dim, hidden_size=128):
    """Synthetic init mirroring nn.Linear shapes; weights stored as (in, out)."""
    D = obs_n_dim + act_n_dim
    k1, k2, k3 = jax.random.split(key, 3)

    def linear(k, fan_in, fan_out):
        bound = 1.0 / jnp.sqrt(jnp.float32(fan_in))
        kw, kb = jax.random.split(k)
        w = jax.random.uniform(kw, (fan_in, fan_out), jnp.float32, -bound, bound)
        b = jax.random.uniform(kb, (1, fan_out), jnp.float32, -bound, bound)
        return w, b

    w1, b1 = linear(k1, D, hidden_size)
    w2, b2 = linear(k2, hidden_size, hidden_size)
    w3, b3 = linear(k3, hidden_size, 1)
    return {"w1": w1, "b1": b1, "w2": w2, "b2": b2, "w3": w3, "b3": b3}


def _reference(obs_n, act_n, params):
    hi = jax.lax.Precision.HIGHEST
    s_a = jnp.concatenate([obs_n, act_n], axis=1)
    h1 = jnp.maximum(jnp.dot(s_a, params["w1"], precision=hi) + params["b1"], 0.0)
    h2 = jnp.maximum(jnp.dot(h1, params["w2"], precision=hi) + params["b2"], 0.0)
    return jnp.dot(h2, params["w3"], precision=hi) + params["b3"]


if __name__ == "__main__":
    # Small shapes consistent with MATD3 on simple_spread:
    # joint obs dim = 24, joint act dim = 8, hidden = 128 (module default).
    # Two critics stacked (the MATD3 twin critics) evaluated in one kernel call.
    B, OBS_N_DIM, ACT_N_DIM, HIDDEN = 8, 24, 8, 128
    N_CRITICS = 2

    key = jax.random.PRNGKey(0)
    k_obs, k_act, k_par = jax.random.split(key, 3)
    obs_n = jax.random.normal(k_obs, (B, OBS_N_DIM), jnp.float32)
    act_n = jax.random.normal(k_act, (B, ACT_N_DIM), jnp.float32)
    params_list = [init_params(k, OBS_N_DIM, ACT_N_DIM, HIDDEN)
                   for k in jax.random.split(k_par, N_CRITICS)]

    # Pack once (amortized over all forward calls in a real training loop).
    packed = jax.block_until_ready(
        pack_params(params_list, OBS_N_DIM, ACT_N_DIM, HIDDEN))

    q_all = jax.block_until_ready(
        critic_forward(obs_n, act_n, packed,
                       hidden=HIDDEN, n_critics=N_CRITICS))

    assert q_all.shape == (N_CRITICS, B), q_all.shape
    for c in range(N_CRITICS):
        q_c = q_all[c].reshape(B, 1)
        q_ref = _reference(obs_n, act_n, params_list[c])
        # Tolerance deliberately looser than pure f32: in-kernel dots use the
        # MXU's default precision while the reference uses Precision.HIGHEST.
        assert jnp.allclose(q_c, q_ref, atol=2e-3, rtol=2e-3), (c, q_c, q_ref)
    print("KERNEL_OK")
</pallas_src>

<mosaic_0001>
module attributes {stable_mosaic.version = 11 : i64} {
  func.func @_critic_kernel(%arg0: i32, %arg1: memref<8x32xf32, #tpu.memory_space<vmem>>, %arg2: memref<296x256xf32, #tpu.memory_space<vmem>>, %arg3: memref<2x8xf32, #tpu.memory_space<vmem>>) attributes {dimension_semantics = [#tpu.dimension_semantics<parallel>], iteration_bounds = array<i64: 1>, scalar_prefetch = 0 : i64, scratch_operands = 0 : i64, tpu.core_type = #tpu.core_type<tc>, window_params = [{transform_indices = @transform_0, window_bounds = array<i64: 8, 32>}, {pipeline_mode = #tpu.pipeline_mode<synchronous>, transform_indices = @transform_1, window_bounds = array<i64: 296, 256>}, {transform_indices = @transform_2, window_bounds = array<i64: 2, 8>}]} {
    %c0 = arith.constant 0 : index
    %c0_0 = arith.constant 0 : index
    %0 = vector.load %arg2[%c0, %c0_0] : memref<296x256xf32, #tpu.memory_space<vmem>>, vector<256x256xf32>
    %c256 = arith.constant 256 : index
    %c0_1 = arith.constant 0 : index
    %1 = vector.load %arg2[%c256, %c0_1] : memref<296x256xf32, #tpu.memory_space<vmem>>, vector<32x256xf32>
    %c288 = arith.constant 288 : index
    %c0_2 = arith.constant 0 : index
    %2 = vector.load %arg2[%c288, %c0_2] : memref<296x256xf32, #tpu.memory_space<vmem>>, vector<1x256xf32>
    %c289 = arith.constant 289 : index
    %c0_3 = arith.constant 0 : index
    %3 = vector.load %arg2[%c289, %c0_3] : memref<296x256xf32, #tpu.memory_space<vmem>>, vector<1x256xf32>
    %c290 = arith.constant 290 : index
    %c0_4 = arith.constant 0 : index
    %4 = vector.load %arg2[%c290, %c0_4] : memref<296x256xf32, #tpu.memory_space<vmem>>, vector<2x256xf32>
    %c292 = arith.constant 292 : index
    %c0_5 = arith.constant 0 : index
    %5 = vector.load %arg2[%c292, %c0_5] : memref<296x256xf32, #tpu.memory_space<vmem>>, vector<2x1xf32>
    %c0_6 = arith.constant 0 : index
    %c0_7 = arith.constant 0 : index
    %6 = vector.load %arg1[%c0_6, %c0_7] : memref<8x32xf32, #tpu.memory_space<vmem>>, vector<8x32xf32>
    %cst = arith.constant dense<0.000000e+00> : vector<8x256xf32>
    %7 = tpu.matmul %6, %1, %cst {dimension_numbers = #tpu.dot_dimension_numbers<[1], [0], [0], [1], [0, 0, 1, 1], [], []>} : vector<8x32xf32>, vector<32x256xf32>, vector<8x256xf32> -> vector<8x256xf32>
    %8 = vector.broadcast %2 : vector<1x256xf32> to vector<8x256xf32>
    %9 = arith.addf %7, %8 : vector<8x256xf32>
    %cst_8 = arith.constant 0.000000e+00 : f32
    %10 = vector.broadcast %cst_8 : f32 to vector<8x256xf32>
    %11 = arith.maximumf %9, %10 : vector<8x256xf32>
    %cst_9 = arith.constant dense<0.000000e+00> : vector<8x256xf32>
    %12 = tpu.matmul %11, %0, %cst_9 {dimension_numbers = #tpu.dot_dimension_numbers<[1], [0], [0], [1], [0, 0, 1, 1], [], []>} : vector<8x256xf32>, vector<256x256xf32>, vector<8x256xf32> -> vector<8x256xf32>
    %13 = vector.broadcast %3 : vector<1x256xf32> to vector<8x256xf32>
    %14 = arith.addf %12, %13 : vector<8x256xf32>
    %cst_10 = arith.constant 0.000000e+00 : f32
    %15 = vector.broadcast %cst_10 : f32 to vector<8x256xf32>
    %16 = arith.maximumf %14, %15 : vector<8x256xf32>
    %cst_11 = arith.constant dense<0.000000e+00> : vector<2x8xf32>
    %17 = tpu.matmul %4, %16, %cst_11 {dimension_numbers = #tpu.dot_dimension_numbers<[1], [1], [0], [0], [0, 0, 1, 0], [], []>} : vector<2x256xf32>, vector<8x256xf32>, vector<2x8xf32> -> vector<2x8xf32>
    %18 = vector.broadcast %5 : vector<2x1xf32> to vector<2x8xf32>
    %19 = arith.addf %17, %18 : vector<2x8xf32>
    %c0_12 = arith.constant 0 : index
    %c0_13 = arith.constant 0 : index
    %20 = vector.load %arg3[%c0_12, %c0_13] : memref<2x8xf32, #tpu.memory_space<vmem>>, vector<2x8xf32>
    tpu.vector_store %arg3[%c0_12, %c0_13], %19 {strides = array<i32>} : memref<2x8xf32, #tpu.memory_space<vmem>>, vector<2x8xf32>,
    return
  }
  func.func @transform_0(%arg0: i32) -> (i32, i32) {
    %c0_i32 = arith.constant 0 : i32
    %c0_i32_0 = arith.constant 0 : i32
    return %arg0, %c0_i32 : i32, i32
  }
  func.func @transform_1(%arg0: i32) -> (i32, i32) {
    %c0_i32 = arith.constant 0 : i32
    %c0_i32_0 = arith.constant 0 : i32
    %c0_i32_1 = arith.constant 0 : i32
    return %c0_i32, %c0_i32_0 : i32, i32
  }
  func.func @transform_2(%arg0: i32) -> (i32, i32) {
    %c0_i32 = arith.constant 0 : i32
    %c0_i32_0 = arith.constant 0 : i32
    return %c0_i32, %arg0 : i32, i32
  }
}

</mosaic_0001>

<bundles_post_ra>
// kernel: tpu_custom_call.1
= control target key start
LH: loop header
LB: loop body
LE: loop exit
PB: predicated region body
PF: predicated region fallthrough
CT: control target
= control target key end

     0   :  { %7 = vsyncpa [#allocation3], 0  ;;  %s608_s0 = inlined_call_operand.hbm [shape: f32[8,32], index: 0, kind: input, shape index: {}]   ;;  %s609_s1 = inlined_call_operand.hbm [shape: f32[296,256], index: 1, kind: input, shape index: {}]   ;;  %s610_s2 = inlined_call_operand.hbm [shape: f32[2,8], index: 2, kind: output, shape index: {}]  }
   0x1   :  { %8 = vsyncpa [#allocation6], 0 }
   0x2   :  { %9 = vsyncpa [#allocation4], 0  ;;  %s543_s9 = smov [#allocation2]   ;;  %s544_s11 = smov [#allocation5]  }
   0x3   :  { %s16_s10 = sshll.u32 %s543_s9, 4  ;;  %s25_s12 = sshll.u32 %s544_s11, 4  ;;  %s17_s10 = int_to_ptr.vmem [resolvable:$true] %s16_s10  ;;  %s565_s12 = int_to_ptr.vmem [resolvable:$true] %s25_s12 }
   0x4   :  { %s471_s15 = scalar_lea.hbm %s608_s0, 128 }
   0x5   :  { %p472_p0 = scmp.ne.s32.totalorder %s608_s0, %s471_s15  ;;  %p475_p1 = scmp.lt.u32.totalorder %s471_s15, %s608_s0 }
   0x7   :  { %p477_p2 = pnand %p475_p1, %p472_p0 }
   0x9   :  { %480 = shalt.err (!%p477_p2)
}
   0xa   :  { %s481_s20 = scalar_lea.vmem %s17_s10, 128  ;;  %p486_p4 = scmp.lt.s32.totalorder %s17_s10, %s17_s10 }
   0xb   :  { %p482_p3 = scmp.ne.s32.totalorder %s17_s10, %s481_s20  ;;  %p487_p5 = scmp.lt.s32.totalorder %s481_s20, %s481_s20 }
   0xd   :  { %p488_p6 = por %p487_p5, %p486_p4 }
   0xf   :  { %p489_p7 = pnand %p488_p6, %p482_p3 }
  0x11   :  { %492 = shalt.err (!%p489_p7)
}
  0x12   :  { %19 = dma.hbm_to_vmem [thread:$0]  %s608_s0, 128, %s17_s10, [#allocation3]  }
  0x13   :  { %s493_s25 = scalar_lea.hbm %s609_s1, 9472 }
  0x14   :  { %p494_p8 = scmp.ne.s32.totalorder %s609_s1, %s493_s25  ;;  %p497_p9 = scmp.lt.u32.totalorder %s493_s25, %s609_s1 }
  0x16   :  { %p499_p10 = pnand %p497_p9, %p494_p8 }
  0x18   :  { %502 = shalt.err (!%p499_p10)
}
  0x19   :  { %s503_s30 = scalar_lea.vmem %s565_s12, 9472  ;;  %p508_p12 = scmp.lt.s32.totalorder %s565_s12, %s565_s12 }
  0x1a   :  { %p504_p11 = scmp.ne.s32.totalorder %s565_s12, %s503_s30  ;;  %p509_p13 = scmp.lt.s32.totalorder %s503_s30, %s503_s30 }
  0x1c   :  { %p510_p0 = por %p509_p13, %p508_p12 }
  0x1e   :  { %p511_p1 = pnand %p510_p0, %p504_p11 }
  0x20   :  { %514 = shalt.err (!%p511_p1)
}
  0x21   :  { %s545_s0 = smov 256   ;;  %s546_s3 = smov 16  }
  0x22   :  { %31 = dma.hbm_to_vmem [thread:$0]  %s609_s1, 9472, %s565_s12, [#allocation6], %s545_s0, %s545_s0, %s546_s3  }
  0x23   :  { %537 = dma.done.wait [#allocation3], 128  }
  0x24   :  { %538 = vsyncadd [#allocation3], 4294967168 }
  0x25   :  { %539 = dma.done.wait [#allocation6], 9472  }
  0x26   :  { %540 = vsyncadd [#allocation6], 4294957824  ;;  %v547_v0 = vmov 0.0   ;;  %v103_v1 = vld [vmem:[#allocation5 + $0x208] sm:$0xff]  ;;  %v105_v2 = vld [vmem:[#allocation5 + $0x218] sm:$0xff]  ;;  %vm129_vm0 = vcmask 261120  }
  0x27   :  { %197 = vmatprep.mubr.f32.mxu0 %v547_v0  ;;  %v102_v3 = vld [vmem:[#allocation5 + $0x200] sm:$0xff]  ;;  %v391_v4 = vpack.c.bf16 %v105_v2, %v103_v1  ;;  %v104_v5 = vld [vmem:[#allocation5 + $0x210] sm:$0xff]  ;;  %v107_v6 = vld [vmem:[#allocation5 + $0x228] sm:$0xff]  ;;  %s549_s1 = smov [#allocation7]   ;;  %vm372_vm1 = vcmask 58368  }
  0x28   :  { %v109_v7 = vld [vmem:[#allocation5 + $0x238] sm:$0xff]  ;;  %v393_v8 = vpack.c.bf16 %v104_v5, %v102_v3  ;;  %v106_v10 = vld [vmem:[#allocation5 + $0x220] sm:$0xff]  ;;  %v108_v11 = vld [vmem:[#allocation5 + $0x230] sm:$0xff]  ;;  %s380_s6 = sshll.u32 %s549_s1, 4  ;;  %s381_s6 = int_to_ptr.vmem [resolvable:$true] %s380_s6 }
  0x29   :  { %v395_v9 = vpack.c.bf16 %v109_v7, %v107_v6  ;;  %392 = vmatprep.subr.bf16.mxu0 %v391_v4  ;;  %v39_v12 = vld [vmem:[#allocation5 + $0x8] sm:$0xff]  ;;  %v41_v13 = vld [vmem:[#allocation5 + $0x18] sm:$0xff]  ;;  %v38_v14 = vld [vmem:[#allocation5] sm:$0xff]  ;;  %v397_v15 = vpack.c.bf16 %v108_v11, %v106_v10  ;;  %s515_s7 = scalar_lea.vmem %s381_s6, 32  ;;  %p520_p3 = scmp.lt.s32.totalorder %s381_s6, %s381_s6 }
  0x2a   :  { %394 = vmatpush1.bf16.msra.mxu0 %v393_v8  ;;  %v399_v16 = vpack.c.bf16 %v41_v13, %v39_v12  ;;  %v40_v17 = vld [vmem:[#allocation5 + $0x10] sm:$0xff]  ;;  %v43_v18 = vld [vmem:[#allocation5 + $0x28] sm:$0xff]  ;;  %v45_v19 = vld [vmem:[#allocation5 + $0x38] sm:$0xff]  ;;  %p516_p2 = scmp.ne.s32.totalorder %s381_s6, %s515_s7  ;;  %p521_p4 = scmp.lt.s32.totalorder %s515_s7, %s515_s7 }
  0x2b   :  { %396 = vmatprep.subr.bf16.mxu0 %v395_v9  ;;  %v401_v20 = vpack.c.bf16 %v40_v17, %v38_v14  ;;  %v403_v21 = vpack.c.bf16 %v45_v19, %v43_v18  ;;  %v42_v22 = vld [vmem:[#allocation5 + $0x20] sm:$0xff]  ;;  %v44_v23 = vld [vmem:[#allocation5 + $0x30] sm:$0xff]  ;;  %v47_v24 = vld [vmem:[#allocation5 + $0x48] sm:$0xff] }
  0x2c   :  { %400 = vmatprep.subr.bf16.mxu1 %v399_v16  ;;  %v49_v25 = vld [vmem:[#allocation5 + $0x58] sm:$0xff]  ;;  %v405_v26 = vpack.c.bf16 %v44_v23, %v42_v22  ;;  %v46_v29 = vld [vmem:[#allocation5 + $0x40] sm:$0xff]  ;;  %v48_v30 = vld [vmem:[#allocation5 + $0x50] sm:$0xff]  ;;  %p522_p5 = por %p521_p4, %p520_p3 }
  0x2d   :  { %402 = vmatpush1.bf16.msra.mxu1 %v401_v20  ;;  %v117_v27 = vld [vmem:[#allocation2] sm:$0xff]  ;;  %v407_v28 = vpack.c.bf16 %v49_v25, %v47_v24  ;;  %v51_v31 = vld [vmem:[#allocation5 + $0x68] sm:$0xff]  ;;  %v409_v33 = vpack.c.bf16 %v48_v30, %v46_v29  ;;  %v50_v35 = vld [vmem:[#allocation5 + $0x60] sm:$0xff] }
  0x2e   :  { %398 = vmatpush1.bf16.msra.mxu0 %v397_v15  ;;  %404 = vmatprep.subr.bf16.mxu1 %v403_v21  ;;  %v53_v32 = vld [vmem:[#allocation5 + $0x78] sm:$0xff]  ;;  %v52_v36 = vld [vmem:[#allocation5 + $0x70] sm:$0xff]  ;;  %v55_v37 = vld [vmem:[#allocation5 + $0x88] sm:$0xff]  ;;  %p523_p6 = pnand %p522_p5, %p516_p2 }
  0x2f   :  { %v411_v34 = vpack.c.bf16 %v53_v32, %v51_v31  ;;  %v57_v38 = vld [vmem:[#allocation5 + $0x98] sm:$0xff]  ;;  %v413_v39 = vpack.c.bf16 %v52_v36, %v50_v35  ;;  %v54_v41 = vld [vmem:[#allocation5 + $0x80] sm:$0xff]  ;;  %v56_v42 = vld [vmem:[#allocation5 + $0x90] sm:$0xff] }
  0x30   :  { %v415_v40 = vpack.c.bf16 %v57_v38, %v55_v37  ;;  %v59_v43 = vld [vmem:[#allocation5 + $0xa8] sm:$0xff]  ;;  %v61_v44 = vld [vmem:[#allocation5 + $0xb8] sm:$0xff]  ;;  %v417_v45 = vpack.c.bf16 %v56_v42, %v54_v41  ;;  %v58_v47 = vld [vmem:[#allocation5 + $0xa0] sm:$0xff] }
  0x31   :  { %390 = vmatmul.mubr.msk.f32.vlgmr.msra.gmra.mrb[0].mxu0 %vm129_vm0, %v117_v27  ;;  %406 = vmatpush1.bf16.msra.mxu1 %v405_v26  ;;  %v419_v46 = vpack.c.bf16 %v61_v44, %v59_v43  ;;  %v60_v48 = vld [vmem:[#allocation5 + $0xb0] sm:$0xff]  ;;  %v63_v49 = vld [vmem:[#allocation5 + $0xc8] sm:$0xff]  ;;  %v65_v50 = vld [vmem:[#allocation5 + $0xd8] sm:$0xff] }
  0x32   :  { %408 = vmatprep.subr.bf16.mxu1 %v407_v28  ;;  %v421_v51 = vpack.c.bf16 %v60_v48, %v58_v47  ;;  %v423_v52 = vpack.c.bf16 %v65_v50, %v63_v49  ;;  %v62_v53 = vld [vmem:[#allocation5 + $0xc0] sm:$0xff]  ;;  %v64_v54 = vld [vmem:[#allocation5 + $0xd0] sm:$0xff]  ;;  %v67_v55 = vld [vmem:[#allocation5 + $0xe8] sm:$0xff] }
  0x33   :  { %v69_v56 = vld [vmem:[#allocation5 + $0xf8] sm:$0xff]  ;;  %v425_v57 = vpack.c.bf16 %v64_v54, %v62_v53  ;;  %v66_v59 = vld [vmem:[#allocation5 + $0xe0] sm:$0xff]  ;;  %v68_v60 = vld [vmem:[#allocation5 + $0xf0] sm:$0xff] }
  0x34   :  { %v427_v58 = vpack.c.bf16 %v69_v56, %v67_v55  ;;  %v71_v61 = vld [vmem:[#allocation5 + $0x108] sm:$0xff]  ;;  %v73_v62 = vld [vmem:[#allocation5 + $0x118] sm:$0xff]  ;;  %v429_v63 = vpack.c.bf16 %v68_v60, %v66_v59  ;;  %v70_v1 = vld [vmem:[#allocation5 + $0x100] sm:$0xff] }
  0x35   :  { %410 = vmatpush1.bf16.msra.mxu1 %v409_v33  ;;  %v431_v0 = vpack.c.bf16 %v73_v62, %v71_v61  ;;  %v72_v2 = vld [vmem:[#allocation5 + $0x110] sm:$0xff]  ;;  %v75_v3 = vld [vmem:[#allocation5 + $0x128] sm:$0xff]  ;;  %v77_v4 = vld [vmem:[#allocation5 + $0x138] sm:$0xff]  ;;  %v548_v62 = vmov 0  }
  0x36   :  { %412 = vmatprep.subr.bf16.mxu1 %v411_v34  ;;  %v433_v5 = vpack.c.bf16 %v72_v2, %v70_v1  ;;  %v435_v6 = vpack.c.bf16 %v77_v4, %v75_v3  ;;  %v74_v7 = vld [vmem:[#allocation5 + $0x120] sm:$0xff]  ;;  %v76_v8 = vld [vmem:[#allocation5 + $0x130] sm:$0xff]  ;;  %v79_v9 = vld [vmem:[#allocation5 + $0x148] sm:$0xff]  ;;  %470 = vset.pattern.permute.xlu0 %v548_v62 }
  0x37   :  { %v81_v10 = vld [vmem:[#allocation5 + $0x158] sm:$0xff]  ;;  %v437_v11 = vpack.c.bf16 %v76_v8, %v74_v7  ;;  %v78_v13 = vld [vmem:[#allocation5 + $0x140] sm:$0xff]  ;;  %v80_v14 = vld [vmem:[#allocation5 + $0x150] sm:$0xff] }
  0x38   :  { %v439_v12 = vpack.c.bf16 %v81_v10, %v79_v9  ;;  %v83_v15 = vld [vmem:[#allocation5 + $0x168] sm:$0xff]  ;;  %v85_v16 = vld [vmem:[#allocation5 + $0x178] sm:$0xff]  ;;  %v441_v17 = vpack.c.bf16 %v80_v14, %v78_v13  ;;  %v82_v19 = vld [vmem:[#allocation5 + $0x160] sm:$0xff] }
  0x39   :  { %414 = vmatpush1.bf16.msra.mxu1 %v413_v39  ;;  %v443_v18 = vpack.c.bf16 %v85_v16, %v83_v15  ;;  %v84_v20 = vld [vmem:[#allocation5 + $0x170] sm:$0xff]  ;;  %v87_v21 = vld [vmem:[#allocation5 + $0x188] sm:$0xff]  ;;  %v89_v22 = vld [vmem:[#allocation5 + $0x198] sm:$0xff] }
  0x3a   :  { %416 = vmatprep.subr.bf16.mxu1 %v415_v40  ;;  %v445_v23 = vpack.c.bf16 %v84_v20, %v82_v19  ;;  %v447_v24 = vpack.c.bf16 %v89_v22, %v87_v21  ;;  %v86_v25 = vld [vmem:[#allocation5 + $0x180] sm:$0xff]  ;;  %v88_v26 = vld [vmem:[#allocation5 + $0x190] sm:$0xff]  ;;  %v91_v27 = vld [vmem:[#allocation5 + $0x1a8] sm:$0xff] }
  0x3b   :  { %v93_v28 = vld [vmem:[#allocation5 + $0x1b8] sm:$0xff]  ;;  %v449_v29 = vpack.c.bf16 %v88_v26, %v86_v25  ;;  %v90_v31 = vld [vmem:[#allocation5 + $0x1a0] sm:$0xff]  ;;  %v92_v32 = vld [vmem:[#allocation5 + $0x1b0] sm:$0xff] }
  0x3c   :  { %v451_v30 = vpack.c.bf16 %v93_v28, %v91_v27  ;;  %v95_v33 = vld [vmem:[#allocation5 + $0x1c8] sm:$0xff]  ;;  %v97_v34 = vld [vmem:[#allocation5 + $0x1d8] sm:$0xff]  ;;  %v453_v35 = vpack.c.bf16 %v92_v32, %v90_v31  ;;  %v94_v37 = vld [vmem:[#allocation5 + $0x1c0] sm:$0xff] }
  0x3d   :  { %418 = vmatpush1.bf16.msra.mxu1 %v417_v45  ;;  %v455_v36 = vpack.c.bf16 %v97_v34, %v95_v33  ;;  %v96_v38 = vld [vmem:[#allocation5 + $0x1d0] sm:$0xff]  ;;  %v99_v40 = vld [vmem:[#allocation5 + $0x1e8] sm:$0xff]  ;;  %v101_v41 = vld [vmem:[#allocation5 + $0x1f8] sm:$0xff] }
  0x3e   :  { %420 = vmatprep.subr.bf16.mxu1 %v419_v46  ;;  %v457_v39 = vpack.c.bf16 %v96_v38, %v94_v37  ;;  %v459_v42 = vpack.c.bf16 %v101_v41, %v99_v40  ;;  %v98_v43 = vld [vmem:[#allocation5 + $0x1e0] sm:$0xff]  ;;  %v100_v44 = vld [vmem:[#allocation5 + $0x1f0] sm:$0xff]  ;;  %v119_v46 = vlaneseq  ;;  %v115_v59 = vld [vmem:[#allocation5 + $0x248] sm:$0xc] }
  0x3f   :  { %v461_v45 = vpack.c.bf16 %v100_v44, %v98_v43  ;;  %v111_v49 = vld [vmem:[#allocation5 + $0x240] ss:$8 sm:$0x3]  ;;  %v297_v60 = vrot.slane %v115_v59, 2  ;;  %v116_v61 = vld [vmem:[#allocation5 + $0x240] sm:$0x30] }
  0x40   :  { %v120_v47 = vshrl.u32 %v119_v46, 7  ;;  %292 = vperm.xlu0 %470, %v116_v61  }
  0x41   :  { %422 = vmatpush1.bf16.msra.mxu1 %v421_v51  ;;  %366 = vmatprep.mubr.f32.mxu0 %v297_v60 }
  0x42   :  { %424 = vmatprep.subr.bf16.mxu1 %v423_v52  ;;  %v121_v48 = vsub.s32 0, %v120_v47  ;;  %v125_v50 = vsub.s32 1, %v120_v47 }
  0x44   :  { %v122_v51 = vrot.slane %v111_v49, %v121_v48  ;;  %v126_v52 = vrot.slane %v111_v49, %v125_v50 }
  0x45   :  { %426 = vmatpush1.bf16.msra.mxu1 %v425_v57 }
  0x46   :  { %428 = vmatprep.subr.bf16.mxu1 %v427_v58 }
  0x49   :  { %430 = vmatpush1.bf16.msra.mxu1 %v429_v63  ;;  %v113_v63 = vld [vmem:[#allocation5 + $0x241] ss:$8 sm:$0x3] }
  0x4a   :  { %432 = vmatprep.subr.bf16.mxu1 %v431_v0  ;;  %v210_v0 = vrot.slane %v113_v63, %v121_v48  ;;  %v214_v1 = vrot.slane %v113_v63, %v125_v50 }
  0x4d   :  { %434 = vmatpush1.bf16.msra.mxu1 %v433_v5 }
  0x4e   :  { %436 = vmatprep.subr.bf16.mxu1 %v435_v6  ;;  %v114_v6 = vld [vmem:[#allocation5 + $0x240] sm:$0xc] }
  0x4f   :  { %v296_v9 = vrot.slane %v114_v6, 2 }
  0x51   :  { %438 = vmatpush1.bf16.msra.mxu1 %v437_v11 }
  0x52   :  { %440 = vmatprep.subr.bf16.mxu1 %v439_v12 }
  0x55   :  { %442 = vmatpush1.bf16.msra.mxu1 %v441_v17 }
  0x56   :  { %444 = vmatprep.subr.bf16.mxu1 %v443_v18 }
  0x59   :  { %446 = vmatpush1.bf16.msra.mxu1 %v445_v23 }
  0x5a   :  { %448 = vmatprep.subr.bf16.mxu1 %v447_v24 }
  0x5d   :  { %450 = vmatpush1.bf16.msra.mxu1 %v449_v29 }
  0x5e   :  { %452 = vmatprep.subr.bf16.mxu1 %v451_v30 }
  0x61   :  { %454 = vmatpush1.bf16.msra.mxu1 %v453_v35 }
  0x62   :  { %456 = vmatprep.subr.bf16.mxu1 %v455_v36 }
  0x65   :  { %458 = vmatpush1.bf16.msra.mxu1 %v457_v39 }
  0x66   :  { %460 = vmatprep.subr.bf16.mxu1 %v459_v42 }
  0x69   :  { %462 = vmatpush1.bf16.msra.mxu1 %v461_v45 }
  0xbf   :  { %v293_v10 = vpop.permute.xlu0 %292 }
  0xc0   :  { %v300_v11 = vrot.slane %v293_v10, 4 }
 0x104   :  { %v199_v53 = vpop.f32.mrb[0].mxu0 }
 0x105   :  { %v200_v54 = vadd.f32 %v199_v53, %v122_v51  ;;  %v201_v55 = vpop.f32.mrb[1].mxu0 }
 0x106   :  { %v202_v56 = vadd.f32 %v201_v55, %v126_v52 }
 0x107   :  { %v204_v58 = vmax.f32 %v200_v54, 0.0 }
 0x108   :  { %v205_v57 = vmax.f32 %v202_v56, 0.0 }
 0x10a   :  { %281 = vmatprep.mubr.f32.mxu1 %v205_v57 }
 0x10b   :  { %282 = vmatmul.mubr.f32.vlgmr.msra.gmra.mrb[0].mxu1 %v204_v58 }
 0x1de   :  { %v283_v2 = vpop.f32.mrb[0].mxu1 }
 0x1df   :  { %v284_v3 = vadd.f32 %v283_v2, %v210_v0  ;;  %v285_v4 = vpop.f32.mrb[1].mxu1 }
 0x1e0   :  { %v286_v5 = vadd.f32 %v285_v4, %v214_v1 }
 0x1e1   :  { %v288_v8 = vmax.f32 %v284_v3, 0.0 }
 0x1e2   :  { %v289_v7 = vmax.f32 %v286_v5, 0.0 }
 0x1e4   :  { %302 = vmatprep.subr.mxu0 %v289_v7 }
 0x1e5   :  { %303 = vmatpush1.xpose.msra.mxu0 %v288_v8 }
 0x1e8   :  { %367 = vmatmul.mubr.f32.vlgmr.msra.gmra.mrb[2].mxu0 %v296_v9 }
 0x2bb   :  { %v368_v12 = vpop.f32.mrb[2].mxu0 }
 0x2bc   :  { %v369_v13 = vadd.f32 %v368_v12, %v300_v11  ;;  %v370_v14 = vpop.f32.mrb[3].mxu0 }
 0x2be   :  { %373 = vst.msk [vmem:[#allocation7] sm:$0x3] %vm372_vm1, %v369_v13 }
 0x2bf   :  { %526 = shalt.err (!%p523_p6)
}
 0x2c0   :  { %s527_s10 = scalar_lea.hbm %s610_s2, 32 }
 0x2c1   :  { %p528_p7 = scmp.ne.s32.totalorder %s610_s2, %s527_s10  ;;  %p531_p8 = scmp.lt.u32.totalorder %s527_s10, %s610_s2 }
 0x2c3   :  { %p533_p9 = pnand %p531_p8, %p528_p7 }
 0x2c5   :  { %536 = shalt.err (!%p533_p9)
}
 0x2c6   :  { %383 = dma.vmem_to_hbm [thread:$0]  %s381_s6, 32, %s610_s2, [#allocation4]  }
 0x2c7   :  { %541 = dma.done.wait [#allocation4], 32  }
 0x2c8   :  { %542 = vsyncadd [#allocation4], 4294967264 }
 0x2c9   :  { %387 = vsyncpa [#allocation3], 1 }
 0x2ca   :  { %388 = vsyncpa [#allocation6], 1 }
 0x2cb   :  { %389 = vsyncpa [#allocation4], 1 }

</bundles_post_ra>
